<compile_context>
chip_gen: v6e
topology: v6e:2x2x1
jax: 0.10.0
libtpu: 0.0.40
codegen_flags: <defaults>
</compile_context>

<pallas_src>
import functools

import jax
import jax.numpy as jnp
from jax.experimental import pallas as pl
from jax.experimental.pallas import tpu as pltpu


def _round_up(x, m):
    return (x + m - 1) // m * m


def _cdiv(a, b):
    return -(-a // b)


def _vmem_limit_bytes():
    """Per-generation VMEM limit (bytes) with headroom below physical."""
    phys = 64 * 2 ** 20  # conservative default: v7x per-TensorCore physical VMEM
    try:
        info = pltpu.get_tpu_info()
        phys = int(getattr(info, "vmem_capacity_bytes", phys))
    except Exception:
        pass
    # half of physical (<= 96 MiB) leaves room for compiler scratch / spills.
    return int(min(phys // 2, 96 * 2 ** 20))


# ---------------------------------------------------------------------------
# Pallas kernel: fused  softmax(Q K^T) @ V  with online softmax.
# (softmax_scale and the mask multiplier mm are pre-folded into K / V.)
# ---------------------------------------------------------------------------
def _attn_kernel(q_ref, k_ref, v_ref, o_ref, m_scr, l_scr,
                 *, lb_valid, tb, kv_resident, need_col_mask):
    kb = pl.program_id(2)

    @pl.when(kb == 0)
    def _init():
        m_scr[...] = jnp.full_like(m_scr, -jnp.inf)
        l_scr[...] = jnp.zeros_like(l_scr)
        o_ref[...] = jnp.zeros_like(o_ref)

    q = q_ref[0]                                   # (TF, Dk)  compute dtype
    if kv_resident:
        # K / V hold the full background in VMEM; slice the current column tile.
        off = pl.multiple_of(kb * tb, tb)
        k = k_ref[0, pl.ds(off, tb), :]            # (TB, Dk)
        v = v_ref[0, pl.ds(off, tb), :]            # (TB, Dv)
    else:
        k = k_ref[0]
        v = v_ref[0]

    # one big matmul per tile (K-dim = 9*C padded to >=128), f32 accumulate on MXU
    s = jax.lax.dot_general(q, k, (((1,), (1,)), ((), ())),
                            preferred_element_type=jnp.float32)   # (TF, TB) f32

    if need_col_mask:
        # exclude padded background columns from the softmax entirely
        col = kb * tb + jax.lax.broadcasted_iota(jnp.int32, (1, tb), 1)
        s = jnp.where(col < lb_valid, s, -1e30)

    m_prev = m_scr[...]
    m_new = jnp.maximum(m_prev, jnp.max(s, axis=-1, keepdims=True))
    alpha = jnp.exp(m_prev - m_new)
    e = jnp.exp(s - m_new)                         # (TF, TB) f32

    l_scr[...] = alpha * l_scr[...] + jnp.sum(e, axis=-1, keepdims=True)
    # output block is VMEM-resident across the kb axis -> accumulate in place (f32)
    o_ref[0] = alpha * o_ref[0] + jnp.dot(
        e.astype(v.dtype), v, preferred_element_type=jnp.float32)
    m_scr[...] = m_new

    @pl.when(kb == pl.num_programs(2) - 1)
    def _finish():
        o_ref[0] = o_ref[0] * pl.reciprocal(l_scr[...], approx=True)


# ---------------------------------------------------------------------------
# Plain-JAX glue: patch extraction (im2col) and the transposed-conv fold.
# ---------------------------------------------------------------------------
def _extract_patches_nhwc(x, ksize, stride, pad):
    """x: (N, H, W, C) -> (N, Ho, Wo, ksize*ksize, C), patch order (kh, kw)."""
    n, h, w, c = x.shape
    xp = jnp.pad(x, ((0, 0), (pad, pad), (pad, pad), (0, 0)))
    ho = (h + 2 * pad - ksize) // stride + 1
    wo = (w + 2 * pad - ksize) // stride + 1
    cols = []
    for kh in range(ksize):
        for kw in range(ksize):
            cols.append(xp[:, kh:kh + stride * (ho - 1) + 1:stride,
                           kw:kw + stride * (wo - 1) + 1:stride, :])
    return jnp.stack(cols, axis=3), ho, wo


def _fold_stride2_pad1(r):
    """Inverse of 4x4 / stride-2 / pad-1 patch extraction (== conv_transpose2d).

    r: (N, Hs, Ws, 4, 4, C) -> (N, 2*Hs, 2*Ws, C), overlapping patches summed.
    Scatter-free: 4 parity-interleaved images, padded and added.
    """
    n, hs, ws, kh, kw, c = r.shape
    assert kh == 4 and kw == 4
    rr = r.reshape(n, hs, ws, 2, 2, 2, 2, c)      # kh = 2*a + p, kw = 2*b + q
    out = jnp.zeros((n, 2 * hs + 2, 2 * ws + 2, c), r.dtype)
    for a in range(2):
        for b in range(2):
            x = rr[:, :, :, a, :, b, :, :]        # (N, Hs, Ws, p, q, C)
            x = jnp.transpose(x, (0, 1, 3, 2, 4, 5)).reshape(n, 2 * hs, 2 * ws, c)
            out = out + jnp.pad(
                x, ((0, 0), (2 * a, 2 - 2 * a), (2 * b, 2 - 2 * b), (0, 0)))
    return out[:, 1:1 + 2 * hs, 1:1 + 2 * ws, :]


def _prepare_attention_inputs(f, b, mask, *, ksize, rate, n_down):
    """Builds Q / normalised-masked K / masked V row matrices (f32)."""
    n, c, hf, wf = f.shape
    _, _, hb, wb = b.shape

    f_nhwc = jnp.transpose(f.astype(jnp.float32), (0, 2, 3, 1))
    b_nhwc = jnp.transpose(b.astype(jnp.float32), (0, 2, 3, 1))

    # nearest-neighbour 1/2 downsample (F.interpolate(scale_factor=0.5, 'nearest'))
    f_s = f_nhwc[:, ::rate, ::rate, :]
    b_s = b_nhwc[:, ::rate, ::rate, :]
    hfs, wfs = f_s.shape[1], f_s.shape[2]
    hbs, wbs = b_s.shape[1], b_s.shape[2]
    lf, lb = hfs * wfs, hbs * wbs

    pad = (ksize - 1) // 2
    qpat, _, _ = _extract_patches_nhwc(f_s, ksize, 1, pad)       # (N,Hfs,Wfs,9,C)
    q = qpat.reshape(n, lf, ksize * ksize * c)

    kpat, _, _ = _extract_patches_nhwc(b_s, ksize, 1, pad)       # (N,Hbs,Wbs,9,C)
    k = kpat.reshape(n, lb, ksize * ksize * c)
    knorm = jnp.sqrt(jnp.sum(jnp.square(k), axis=-1, keepdims=True))
    k = k / jnp.maximum(knorm, 1e-4)                             # clamp_min(1e-4)

    kernel_sz = 2 * rate
    vpat, hv, wv = _extract_patches_nhwc(b_nhwc, kernel_sz, rate, rate - 1)
    assert hv == hbs and wv == wbs
    v = vpat.reshape(n, lb, kernel_sz * kernel_sz * c)

    # mask -> per-background-patch multiplier mm (from batch element 0, like torch)
    if mask is None:
        mm = jnp.ones((lb,), jnp.float32)
    else:
        ds = (2 ** n_down) * rate
        m_nhwc = jnp.transpose(mask.astype(jnp.float32), (0, 2, 3, 1))[:, ::ds, ::ds, :]
        mpat, hm, wm = _extract_patches_nhwc(m_nhwc, ksize, 1, pad)
        assert hm * wm == lb, "mask resolution inconsistent with background"
        mm = (jnp.mean(mpat[0].reshape(lb, -1), axis=-1) == 0.0).astype(jnp.float32)

    # fold pre-softmax (*mm on scores) into K and post-softmax (*mm) into V
    k = k * mm[None, :, None]
    v = v * mm[None, :, None]
    return q, k, v, (hfs, wfs, hbs, wbs, c)


# ---------------------------------------------------------------------------
# Public forward pass.
# ---------------------------------------------------------------------------
def contextual_attention(f, b, mask=None, *, ksize=3, stride=1, rate=2,
                         softmax_scale=10.0, n_down=2,
                         compute_dtype=jnp.bfloat16):
    """ContextualAttention.forward (fuse=False, return_flow=False). NCHW in/out."""
    assert ksize == 3 and stride == 1 and rate == 2, (
        "kernel implements the canonical ksize=3, stride=1, rate=2 configuration")
    n, c, hf, wf = f.shape
    nb, cb, hb, wb = b.shape
    assert n == nb and c == cb
    assert hf % 2 == 0 and wf % 2 == 0 and hb % 2 == 0 and wb % 2 == 0

    q, k, v, (hfs, wfs, hbs, wbs, _) = _prepare_attention_inputs(
        f, b, mask, ksize=ksize, rate=rate, n_down=n_down)
    # fold softmax_scale into K (removes a per-step (TF,TB) VPU multiply)
    k = k * jnp.float32(softmax_scale)

    lf, lb = hfs * wfs, hbs * wbs
    dk, dv = q.shape[-1], v.shape[-1]

    # ---- lane-dense / VMEM-budgeted tiling -------------------------------
    dk_pad = _round_up(dk, 128)
    dv_pad = _round_up(dv, 128)
    itemsize = jnp.dtype(compute_dtype).itemsize

    vmem_limit = _vmem_limit_bytes()
    budget = int(0.85 * vmem_limit)

    def vmem_bytes(tf_, kv_rows):
        q_b = 2 * tf_ * dk_pad * itemsize          # double-buffered Q tile
        k_b = 2 * kv_rows * dk_pad * itemsize      # K (tile or resident)
        v_b = 2 * kv_rows * dv_pad * itemsize      # V (tile or resident)
        o_b = 2 * tf_ * dv_pad * 4                 # double-buffered f32 output block
        scr = 2 * tf_ * 128 * 4                    # (tf,1) f32 scratches, lane-padded
        return q_b + k_b + v_b + o_b + scr

    tf = min(256, _round_up(lf, 16))
    # keep at least 2 "parallel" grid blocks so v7x megacore has work at N=1
    while n * _cdiv(lf, tf) < 2 and tf > 16:
        tf = max(16, _round_up(tf // 2, 16))

    tb = min(512, _round_up(lb, 16))
    lb_pad = _round_up(lb, tb)

    # K/V resident per batch (DMA'd once) when they fit the budget.
    kv_resident = vmem_bytes(tf, lb_pad) <= budget
    if not kv_resident:
        while vmem_bytes(tf, tb) > budget and tb > 16:
            tb = max(16, _round_up(tb // 2, 16))
        while vmem_bytes(tf, tb) > budget and tf > 16:
            tf = max(16, _round_up(tf // 2, 16))
        lb_pad = _round_up(lb, tb)

    lf_pad = _round_up(lf, tf)
    need_col_mask = (lb_pad != lb)

    def pad2(x, rows, cols):
        return jnp.pad(x, ((0, 0), (0, rows - x.shape[1]), (0, cols - x.shape[2])))

    qp = pad2(q, lf_pad, dk_pad).astype(compute_dtype)
    kp = pad2(k, lb_pad, dk_pad).astype(compute_dtype)
    vp = pad2(v, lb_pad, dv_pad).astype(compute_dtype)

    if kv_resident:
        k_spec = pl.BlockSpec((1, lb_pad, dk_pad), lambda bn, i, kk: (bn, 0, 0))
        v_spec = pl.BlockSpec((1, lb_pad, dv_pad), lambda bn, i, kk: (bn, 0, 0))
    else:
        k_spec = pl.BlockSpec((1, tb, dk_pad), lambda bn, i, kk: (bn, kk, 0))
        v_spec = pl.BlockSpec((1, tb, dv_pad), lambda bn, i, kk: (bn, kk, 0))

    kernel = functools.partial(_attn_kernel, lb_valid=lb, tb=tb,
                               kv_resident=kv_resident,
                               need_col_mask=need_col_mask)

    r = pl.pallas_call(
        kernel,
        out_shape=jax.ShapeDtypeStruct((n, lf_pad, dv_pad), jnp.float32),
        grid_spec=pltpu.PrefetchScalarGridSpec(
            num_scalar_prefetch=0,
            grid=(n, lf_pad // tf, lb_pad // tb),
            in_specs=[
                pl.BlockSpec((1, tf, dk_pad), lambda bn, i, kk: (bn, i, 0)),
                k_spec,
                v_spec,
            ],
            out_specs=pl.BlockSpec((1, tf, dv_pad), lambda bn, i, kk: (bn, i, 0)),
            scratch_shapes=[
                pltpu.VMEM((tf, 1), jnp.float32),       # running max
                pltpu.VMEM((tf, 1), jnp.float32),       # running denom
            ],
        ),
        compiler_params=pltpu.CompilerParams(
            dimension_semantics=("parallel", "parallel", "arbitrary"),
            vmem_limit_bytes=int(vmem_limit)),
    )(qp, kp, vp)

    # r[n, p, :] = attention-weighted raw 4x4xC background patch for fg pos p
    r = r[:, :lf, :dv].reshape(n, hfs, wfs, 4, 4, c)
    y_nhwc = _fold_stride2_pad1(r) * 0.25            # conv_transpose2d(...)/4
    y = jnp.transpose(y_nhwc, (0, 3, 1, 2))          # back to NCHW
    return y, None
    # TODO(synk): return_flow=True (argmax -> numpy color-wheel flow image) and
    # fuse=True (identity-kernel fuse convs) paths are not implemented.


# ---------------------------------------------------------------------------
# Plain-XLA reference (same math & same bf16 input quantisation, no Pallas)
# for a self-consistency check of the fused kernel.
# ---------------------------------------------------------------------------
def _contextual_attention_reference(f, b, mask=None, *, softmax_scale=10.0,
                                    n_down=2, compute_dtype=jnp.bfloat16):
    q, k, v, (hfs, wfs, _, _, c) = _prepare_attention_inputs(
        f, b, mask, ksize=3, rate=2, n_down=n_down)
    n = q.shape[0]
    qc = q.astype(compute_dtype)
    kc = (k * jnp.float32(softmax_scale)).astype(compute_dtype)
    vc = v.astype(compute_dtype)
    s = jnp.einsum('nld,nmd->nlm', qc, kc, preferred_element_type=jnp.float32)
    a = jax.nn.softmax(s, axis=-1)
    r = jnp.einsum('nlm,nmd->nld', a.astype(compute_dtype), vc,
                   preferred_element_type=jnp.float32)
    r = r.reshape(n, hfs, wfs, 4, 4, c)
    y_nhwc = _fold_stride2_pad1(r) * 0.25
    return jnp.transpose(y_nhwc, (0, 3, 1, 2))


if __name__ == "__main__":
    key = jax.random.PRNGKey(0)
    key_f, key_b = jax.random.split(key)

    N, C, H, W = 2, 4, 16, 16          # small shapes; feature maps in NCHW
    f = jax.random.normal(key_f, (N, C, H, W), dtype=jnp.float32)
    b = jax.random.normal(key_b, (N, C, H, W), dtype=jnp.float32)

    fwd = jax.jit(contextual_attention)
    y, _flow = fwd(f, b)
    jax.block_until_ready(y)
    assert y.shape == (N, C, H, W), y.shape

    # consistency check of the fused kernel vs the plain-XLA formulation
    y_ref = _contextual_attention_reference(f, b)
    err = float(jnp.max(jnp.abs(y - y_ref)))
    assert err < 5e-2, f"kernel mismatch vs reference: max abs err {err}"

    print("KERNEL_OK")
</pallas_src>

<mosaic_0001>
module attributes {stable_mosaic.version = 11 : i64} {
  func.func @_attn_kernel(%arg0: i32, %arg1: i32, %arg2: i32, %arg3: memref<1x64x128xbf16, #tpu.memory_space<vmem>>, %arg4: memref<1x64x128xbf16, #tpu.memory_space<vmem>>, %arg5: memref<1x64x128xbf16, #tpu.memory_space<vmem>>, %arg6: memref<1x64x128xf32, #tpu.memory_space<vmem>>, %arg7: memref<64x1xf32, #tpu.memory_space<vmem>>, %arg8: memref<64x1xf32, #tpu.memory_space<vmem>>) attributes {dimension_semantics = [#tpu.dimension_semantics<parallel>, #tpu.dimension_semantics<parallel>, #tpu.dimension_semantics<arbitrary>], iteration_bounds = array<i64: 2, 1, 1>, scalar_prefetch = 0 : i64, scratch_operands = 2 : i64, tpu.core_type = #tpu.core_type<tc>, window_params = [{transform_indices = @transform_0, window_bounds = array<i64: 1, 64, 128>}, {transform_indices = @transform_1, window_bounds = array<i64: 1, 64, 128>}, {transform_indices = @transform_2, window_bounds = array<i64: 1, 64, 128>}, {transform_indices = @transform_3, window_bounds = array<i64: 1, 64, 128>}]} {
    %c0_i32 = arith.constant 0 : i32
    %0 = arith.cmpi eq, %arg2, %c0_i32 : i32
    %1 = arith.extui %0 : i1 to i32
    %c0_i32_0 = arith.constant 0 : i32
    %2 = arith.cmpi ne, %1, %c0_i32_0 : i32
    scf.if %2 {
      %cst_26 = arith.constant 0xFF800000 : f32
      %43 = vector.broadcast %cst_26 : f32 to vector<64x1xf32>
      %c0_27 = arith.constant 0 : index
      %c0_28 = arith.constant 0 : index
      %44 = vector.load %arg7[%c0_27, %c0_28] : memref<64x1xf32, #tpu.memory_space<vmem>>, vector<64x1xf32>
      tpu.vector_store %arg7[%c0_27, %c0_28], %43 {strides = array<i32>} : memref<64x1xf32, #tpu.memory_space<vmem>>, vector<64x1xf32>,
      %cst_29 = arith.constant 0.000000e+00 : f32
      %45 = vector.broadcast %cst_29 : f32 to vector<64x1xf32>
      %c0_30 = arith.constant 0 : index
      %c0_31 = arith.constant 0 : index
      %46 = vector.load %arg8[%c0_30, %c0_31] : memref<64x1xf32, #tpu.memory_space<vmem>>, vector<64x1xf32>
      tpu.vector_store %arg8[%c0_30, %c0_31], %45 {strides = array<i32>} : memref<64x1xf32, #tpu.memory_space<vmem>>, vector<64x1xf32>,
      %cst_32 = arith.constant 0.000000e+00 : f32
      %47 = vector.broadcast %cst_32 : f32 to vector<1x64x128xf32>
      %c0_33 = arith.constant 0 : index
      %c0_34 = arith.constant 0 : index
      %c0_35 = arith.constant 0 : index
      %48 = vector.load %arg6[%c0_33, %c0_34, %c0_35] : memref<1x64x128xf32, #tpu.memory_space<vmem>>, vector<1x64x128xf32>
      tpu.vector_store %arg6[%c0_33, %c0_34, %c0_35], %47 {strides = array<i32>} : memref<1x64x128xf32, #tpu.memory_space<vmem>>, vector<1x64x128xf32>,
    } else {
    }
    %c0 = arith.constant 0 : index
    %c0_1 = arith.constant 0 : index
    %c0_2 = arith.constant 0 : index
    %3 = vector.load %arg3[%c0, %c0_1, %c0_2] : memref<1x64x128xbf16, #tpu.memory_space<vmem>>, vector<1x64x128xbf16>
    %4 = vector.shape_cast %3 : vector<1x64x128xbf16> to vector<64x128xbf16>
    %c64_i32 = arith.constant 64 : i32
    %5 = arith.muli %arg2, %c64_i32 : i32
    %6 = tpu.assume_multiple %5, 64 : i32
    %c0_3 = arith.constant 0 : index
    %7 = arith.index_cast %6 : i32 to index
    %c0_4 = arith.constant 0 : index
    %8 = vector.load %arg4[%c0_3, %7, %c0_4] : memref<1x64x128xbf16, #tpu.memory_space<vmem>>, vector<1x64x128xbf16>
    %9 = vector.shape_cast %8 : vector<1x64x128xbf16> to vector<64x128xbf16>
    %c0_5 = arith.constant 0 : index
    %10 = arith.index_cast %6 : i32 to index
    %c0_6 = arith.constant 0 : index
    %11 = vector.load %arg5[%c0_5, %10, %c0_6] : memref<1x64x128xbf16, #tpu.memory_space<vmem>>, vector<1x64x128xbf16>
    %12 = vector.shape_cast %11 : vector<1x64x128xbf16> to vector<64x128xbf16>
    %cst = arith.constant dense<0.000000e+00> : vector<64x64xf32>
    %13 = tpu.matmul %4, %9, %cst {dimension_numbers = #tpu.dot_dimension_numbers<[1], [1], [0], [0], [0, 0, 1, 0], [], []>} : vector<64x128xbf16>, vector<64x128xbf16>, vector<64x64xf32> -> vector<64x64xf32>
    %c0_7 = arith.constant 0 : index
    %c0_8 = arith.constant 0 : index
    %14 = vector.load %arg7[%c0_7, %c0_8] : memref<64x1xf32, #tpu.memory_space<vmem>>, vector<64x1xf32>
    %cst_9 = arith.constant dense<0xFF800000> : vector<64xf32>
    %15 = vector.multi_reduction <maximumf>, %13, %cst_9 [1] : vector<64x64xf32> to vector<64xf32>
    %16 = vector.shape_cast %15 : vector<64xf32> to vector<64x1xf32>
    %17 = arith.maximumf %14, %16 : vector<64x1xf32>
    %18 = arith.subf %14, %17 : vector<64x1xf32>
    %19 = math.exp %18 : vector<64x1xf32>
    %20 = vector.broadcast %17 : vector<64x1xf32> to vector<64x64xf32>
    %21 = arith.subf %13, %20 : vector<64x64xf32>
    %22 = math.exp %21 : vector<64x64xf32>
    %c0_10 = arith.constant 0 : index
    %c0_11 = arith.constant 0 : index
    %23 = vector.load %arg8[%c0_10, %c0_11] : memref<64x1xf32, #tpu.memory_space<vmem>>, vector<64x1xf32>
    %24 = arith.mulf %19, %23 : vector<64x1xf32>
    %cst_12 = arith.constant dense<0.000000e+00> : vector<64xf32>
    %25 = vector.multi_reduction <add>, %22, %cst_12 [1] : vector<64x64xf32> to vector<64xf32>
    %26 = vector.shape_cast %25 : vector<64xf32> to vector<64x1xf32>
    %27 = arith.addf %24, %26 : vector<64x1xf32>
    %c0_13 = arith.constant 0 : index
    %c0_14 = arith.constant 0 : index
    %28 = vector.load %arg8[%c0_13, %c0_14] : memref<64x1xf32, #tpu.memory_space<vmem>>, vector<64x1xf32>
    tpu.vector_store %arg8[%c0_13, %c0_14], %27 {strides = array<i32>} : memref<64x1xf32, #tpu.memory_space<vmem>>, vector<64x1xf32>,
    %c0_15 = arith.constant 0 : index
    %c0_16 = arith.constant 0 : index
    %c0_17 = arith.constant 0 : index
    %29 = vector.load %arg6[%c0_15, %c0_16, %c0_17] : memref<1x64x128xf32, #tpu.memory_space<vmem>>, vector<1x64x128xf32>
    %30 = vector.shape_cast %29 : vector<1x64x128xf32> to vector<64x128xf32>
    %31 = vector.broadcast %19 : vector<64x1xf32> to vector<64x128xf32>
    %32 = arith.mulf %31, %30 : vector<64x128xf32>
    %33 = arith.truncf %22 : vector<64x64xf32> to vector<64x64xbf16>
    %cst_18 = arith.constant dense<0.000000e+00> : vector<64x128xf32>
    %34 = tpu.matmul %33, %12, %cst_18 {dimension_numbers = #tpu.dot_dimension_numbers<[1], [0], [0], [1], [0, 0, 1, 1], [], []>} : vector<64x64xbf16>, vector<64x128xbf16>, vector<64x128xf32> -> vector<64x128xf32>
    %35 = arith.addf %32, %34 : vector<64x128xf32>
    %c0_19 = arith.constant 0 : index
    %c0_20 = arith.constant 0 : index
    %c0_21 = arith.constant 0 : index
    %36 = vector.load %arg6[%c0_19, %c0_20, %c0_21] : memref<1x64x128xf32, #tpu.memory_space<vmem>>, vector<1x64x128xf32>
    %37 = vector.shape_cast %36 : vector<1x64x128xf32> to vector<64x128xf32>
    %38 = vector.shape_cast %35 : vector<64x128xf32> to vector<1x64x128xf32>
    tpu.vector_store %arg6[%c0_19, %c0_20, %c0_21], %38 {strides = array<i32>} : memref<1x64x128xf32, #tpu.memory_space<vmem>>, vector<1x64x128xf32>,
    %c0_22 = arith.constant 0 : index
    %c0_23 = arith.constant 0 : index
    %39 = vector.load %arg7[%c0_22, %c0_23] : memref<64x1xf32, #tpu.memory_space<vmem>>, vector<64x1xf32>
    tpu.vector_store %arg7[%c0_22, %c0_23], %17 {strides = array<i32>} : memref<64x1xf32, #tpu.memory_space<vmem>>, vector<64x1xf32>,
    %c0_i32_24 = arith.constant 0 : i32
    %40 = arith.cmpi eq, %arg2, %c0_i32_24 : i32
    %41 = arith.extui %40 : i1 to i32
    %c0_i32_25 = arith.constant 0 : i32
    %42 = arith.cmpi ne, %41, %c0_i32_25 : i32
    scf.if %42 {
      %c0_26 = arith.constant 0 : index
      %c0_27 = arith.constant 0 : index
      %c0_28 = arith.constant 0 : index
      %43 = vector.load %arg6[%c0_26, %c0_27, %c0_28] : memref<1x64x128xf32, #tpu.memory_space<vmem>>, vector<1x64x128xf32>
      %44 = vector.shape_cast %43 : vector<1x64x128xf32> to vector<64x128xf32>
      %c0_29 = arith.constant 0 : index
      %c0_30 = arith.constant 0 : index
      %45 = vector.load %arg8[%c0_29, %c0_30] : memref<64x1xf32, #tpu.memory_space<vmem>>, vector<64x1xf32>
      %46 = tpu.reciprocal %45 {approx = true} : vector<64x1xf32> -> vector<64x1xf32>
      %47 = vector.broadcast %46 : vector<64x1xf32> to vector<64x128xf32>
      %48 = arith.mulf %44, %47 : vector<64x128xf32>
      %c0_31 = arith.constant 0 : index
      %c0_32 = arith.constant 0 : index
      %c0_33 = arith.constant 0 : index
      %49 = vector.load %arg6[%c0_31, %c0_32, %c0_33] : memref<1x64x128xf32, #tpu.memory_space<vmem>>, vector<1x64x128xf32>
      %50 = vector.shape_cast %49 : vector<1x64x128xf32> to vector<64x128xf32>
      %51 = vector.shape_cast %48 : vector<64x128xf32> to vector<1x64x128xf32>
      tpu.vector_store %arg6[%c0_31, %c0_32, %c0_33], %51 {strides = array<i32>} : memref<1x64x128xf32, #tpu.memory_space<vmem>>, vector<1x64x128xf32>,
    } else {
    }
    return
  }
  func.func @transform_0(%arg0: i32, %arg1: i32, %arg2: i32) -> (i32, i32, i32) {
    %c0_i32 = arith.constant 0 : i32
    %c0_i32_0 = arith.constant 0 : i32
    return %arg0, %arg1, %c0_i32 : i32, i32, i32
  }
  func.func @transform_1(%arg0: i32, %arg1: i32, %arg2: i32) -> (i32, i32, i32) {
    %c0_i32 = arith.constant 0 : i32
    %c0_i32_0 = arith.constant 0 : i32
    %c0_i32_1 = arith.constant 0 : i32
    return %arg0, %c0_i32, %c0_i32_0 : i32, i32, i32
  }
  func.func @transform_2(%arg0: i32, %arg1: i32, %arg2: i32) -> (i32, i32, i32) {
    %c0_i32 = arith.constant 0 : i32
    %c0_i32_0 = arith.constant 0 : i32
    %c0_i32_1 = arith.constant 0 : i32
    return %arg0, %c0_i32, %c0_i32_0 : i32, i32, i32
  }
  func.func @transform_3(%arg0: i32, %arg1: i32, %arg2: i32) -> (i32, i32, i32) {
    %c0_i32 = arith.constant 0 : i32
    %c0_i32_0 = arith.constant 0 : i32
    return %arg0, %arg1, %c0_i32 : i32, i32, i32
  }
}

</mosaic_0001>

<bundles_post_ra>
// kernel: contextual_attention.1
= control target key start
LH: loop header
LB: loop body
LE: loop exit
PB: predicated region body
PF: predicated region fallthrough
CT: control target
= control target key end

     0   :  { %s1222_s12 = smov 0   ;;  %s1224_s13 = smov 0   ;;  %s1460_s0 = inlined_call_operand.vmem [shape: bf16[2,64,128], index: 0, kind: input, shape index: {}]   ;;  %s1461_s1 = inlined_call_operand.vmem [shape: bf16[2,64,128], index: 1, kind: input, shape index: {}]   ;;  %s1462_s2 = inlined_call_operand.vmem [shape: bf16[2,64,128], index: 2, kind: input, shape index: {}]   ;;  %s1463_s3 = inlined_call_operand.vmem [shape: f32[2,64,128], index: 3, kind: output, shape index: {}]  }
   0x1   :  { %s1226_s14 = smov 0  }
   0x2 LB: > { %s32_s15 = sadd.s32 1, %s1193_s13  ;;  %p1007_p0 = scmp.ge.s32.totalorder %s1197_s14, 1  ;;  %s1197_s14 = sphi %s1226_s14, %s13_s14   ;;  %s1193_s13 = sphi %s1224_s13, %s1465_s13   ;;  %s1189_s12 = sphi %s1222_s12, %s1464_s12  }
   0x3   : > { %p34_p1 = scmp.ge.s32.totalorder %s32_s15, 2  ;;  %p185_p2 = scmp.lt.s32.totalorder %s1197_s14, 3 }
   0x5   : > { %s1467_s15 = smov (%p34_p1, %s32_s15), 0  ;;  %p186_p3 = pnand %p1007_p0, %p185_p2 }
   0x6   : > { %p228_p4 = scmp.lt.s32.totalorder (!%p186_p3), %s1189_s12, 1 }
   0x7   : > { %189 = sbr.rel (%p186_p3) target bundleno = 841 (0x349), region = 32 }
   0xc   : > { %s1469_s12 = smov (!%p228_p4, %s1189_s12), 1  ;;  %vm262_vm0 = vcmask 7168   ;;  %v1199_v8 = vmov -inf   ;;  %vm439_vm1 = vcmask 523264   ;;  %v1200_v21 = vmov 0  }
   0xd   : > { %s1243_s16 = sshll.u32 %s1469_s12, 5  ;;  %265 = vst.msk [vmem:[#allocation2 + $0x10] sm:$0xff] %vm262_vm0, %v1199_v8  ;;  %263 = vst.msk [vmem:[#allocation2] sm:$0xff] %vm262_vm0, %v1199_v8  ;;  %1114 = vset.pattern.permute.xlu1 %v1200_v21  ;;  %1113 = vset.pattern.permute.xlu0 %v1200_v21  ;;  %v1201_v26 = vmov 0.0   ;;  %s1037_s26 = sshll.u32 %s1469_s12, 6 }
   0xe   : > { %s241_s19 = scalar_lea.vmem %s1461_s1, %s1243_s16  ;;  %s235_s22 = scalar_lea.vmem %s1460_s0, %s1243_s16  ;;  %264 = vst.msk [vmem:[#allocation2 + $0x8] sm:$0xff] %vm262_vm0, %v1199_v8  ;;  %266 = vst.msk [vmem:[#allocation2 + $0x18] sm:$0xff] %vm262_vm0, %v1199_v8 }
   0xf   : > { %v1115_v0 = vld [vmem:[%s241_s19 + $0x18] sm:$0xff]   ;;  %v1116_v1 = vld [vmem:[%s241_s19 + $0x10] sm:$0xff]   ;;  %v1119_v2 = vld [vmem:[%s235_s22] sm:$0xff]   ;;  %267 = vst.msk [vmem:[#allocation2 + $0x20] sm:$0xff] %vm262_vm0, %v1199_v8  ;;  %s246_s25 = scalar_lea.vmem %s1462_s2, %s1243_s16  ;;  %s1441_s29 = scalar_lea.vmem %s1463_s3, %s1037_s26 }
  0x10   : > { %1054 = vmatprep.subr.bf16.mxu0 %v1115_v0  ;;  %1062 = vmatprep.mubr.bf16.mxu0 %v1119_v2  ;;  %v1117_v3 = vld [vmem:[%s241_s19 + $0x8] sm:$0xff]   ;;  %v1118_v4 = vld [vmem:[%s241_s19] sm:$0xff]   ;;  %v1121_v6 = vld [vmem:[%s235_s22 + $0x10] sm:$0xff]   ;;  %268 = vst.msk [vmem:[#allocation2 + $0x28] sm:$0xff] %vm262_vm0, %v1199_v8 }
  0x11   : > { %1055 = vmatpush3.bf16.xpose.msra.mxu0 %v1115_v0  ;;  %v1120_v5 = vld [vmem:[%s235_s22 + $0x8] sm:$0xff]   ;;  %v1122_v7 = vld [vmem:[%s235_s22 + $0x18] sm:$0xff]   ;;  %269 = vst.msk [vmem:[#allocation2 + $0x30] sm:$0xff] %vm262_vm0, %v1199_v8  ;;  %270 = vst.msk [vmem:[#allocation2 + $0x38] sm:$0xff] %vm262_vm0, %v1199_v8 }
  0x12   : > { %1056 = vmatprep.subr.bf16.mxu0 %v1116_v1  ;;  %273 = vst.msk [vmem:[#allocation3 + $0x10] sm:$0xff] %vm262_vm0, %v1201_v26  ;;  %271 = vst.msk [vmem:[#allocation3] sm:$0xff] %vm262_vm0, %v1201_v26  ;;  %v1123_v48 = vld [vmem:[%s246_s25 + $0x18] sm:$0xff]   ;;  %v1124_v54 = vld [vmem:[%s246_s25 + $0x10] sm:$0xff]  }
  0x13   : > { %272 = vst.msk [vmem:[#allocation3 + $0x8] sm:$0xff] %vm262_vm0, %v1201_v26  ;;  %274 = vst.msk [vmem:[#allocation3 + $0x18] sm:$0xff] %vm262_vm0, %v1201_v26  ;;  %1070 = vmatprep.subr.bf16.mxu1 %v1123_v48  ;;  %v1125_v60 = vld [vmem:[%s246_s25 + $0x8] sm:$0xff]   ;;  %v1126_v62 = vld [vmem:[%s246_s25] sm:$0xff]  }
  0x14   : > { %275 = vst.msk [vmem:[#allocation3 + $0x20] sm:$0xff] %vm262_vm0, %v1201_v26  ;;  %276 = vst.msk [vmem:[#allocation3 + $0x28] sm:$0xff] %vm262_vm0, %v1201_v26  ;;  %v1301_v27 = vld [vmem:[#allocation2 + $0x10] sm:$0xff]  ;;  %v1303_v29 = vld [vmem:[#allocation2] sm:$0xff]  ;;  %1071 = vmatpush3.bf16.msra.mxu1 %v1123_v48 }
  0x15   : > { %277 = vst.msk [vmem:[#allocation3 + $0x30] sm:$0xff] %vm262_vm0, %v1201_v26  ;;  %278 = vst.msk [vmem:[#allocation3 + $0x38] sm:$0xff] %vm262_vm0, %v1201_v26  ;;  %v1308_v32 = vld [vmem:[#allocation2 + $0x18] sm:$0xff]  ;;  %v1318_v36 = vld [vmem:[#allocation2 + $0x8] sm:$0xff]  ;;  %1072 = vmatprep.subr.bf16.mxu1 %v1124_v54 }
  0x16   : > { %v1336_v42 = vld [vmem:[#allocation2 + $0x20] sm:$0xff] }
  0x17   : > { %v1352_v47 = vld [vmem:[#allocation2 + $0x28] sm:$0xff] }
  0x18   : > { %v1342_v45 = vld [vmem:[#allocation2 + $0x30] sm:$0xff]  ;;  %v1364_v55 = vld [vmem:[#allocation2 + $0x38] sm:$0xff]  ;;  %1073 = vmatpush3.bf16.msra.mxu1 %v1124_v54 }
  0x19   : > { %1057 = vmatpush3.bf16.xpose.msra.mxu0 %v1116_v1  ;;  %1074 = vmatprep.subr.bf16.mxu1 %v1125_v60 }
  0x1a   : > { %1058 = vmatprep.subr.bf16.mxu0 %v1117_v3 }
  0x1c   : > { %1075 = vmatpush3.bf16.msra.mxu1 %v1125_v60 }
  0x1d   : > { %1076 = vmatprep.subr.bf16.mxu1 %v1126_v62 }
  0x20   : > { %1077 = vmatpush3.bf16.msra.mxu1 %v1126_v62 }
  0x21   : > { %1059 = vmatpush3.bf16.xpose.msra.mxu0 %v1117_v3 }
  0x22   : > { %1060 = vmatprep.subr.bf16.mxu0 %v1118_v4 }
  0x29   : > { %1061 = vmatpush3.bf16.xpose.msra.mxu0 %v1118_v4 }
  0x30   : > { %1063 = vmatmul.mubr.bf16.vlgmr.msra.gmra.mxu0 %v1120_v5 }
  0x31   : > { %1066 = vmatprep.mubr.bf16.mxu0 %v1121_v6 }
  0x38   : > { %1067 = vmatmul.mubr.bf16.gmra.mxu0 %v1122_v7 }
  0xf0   : > { %v1261_v9 = vpop.f32.mrf.mxu0 }
  0xf1   : > { %v446_v10 = vsel %vm439_vm1, %v1261_v9, -inf }
  0xf2   : > { %447 = vmax.xlane.f32.xlu1 %v446_v10  ;;  %v1265_v11 = vpop.f32.mrf.mxu0 }
  0xf3   : > { %v440_v12 = vsel %vm439_vm1, %v1265_v11, -inf }
  0xf4   : > { %441 = vmax.xlane.f32.xlu0 %v440_v12  ;;  %v1269_v13 = vpop.f32.mrf.mxu0 }
  0xf5   : > { %v449_v14 = vsel %vm439_vm1, %v1269_v13, -inf }
  0xf6   : > { %450 = vmax.xlane.f32.xlu1 %v449_v14  ;;  %v1273_v15 = vpop.f32.mrf.mxu0 }
  0xf7   : > { %v443_v16 = vsel %vm439_vm1, %v1273_v15, -inf }
  0xf8   : > { %444 = vmax.xlane.f32.xlu0 %v443_v16  ;;  %v1277_v17 = vpop.f32.mrf.mxu0 }
  0xf9   : > { %v458_v23 = vsel %vm439_vm1, %v1277_v17, -inf }
  0xfa   : > { %v1279_v18 = vpop.f32.mrf.mxu0 }
  0xfb   : > { %v452_v19 = vsel %vm439_vm1, %v1279_v18, -inf }
  0xfc   : > { %453 = vmax.xlane.f32.xlu0 %v452_v19  ;;  %v1283_v20 = vpop.f32.mrf.mxu0 }
  0xfd   : > { %v461_v25 = vsel %vm439_vm1, %v1283_v20, -inf }
  0xfe   : > { %v1285_v22 = vpop.f32.mrf.mxu0 }
  0xff   : > { %v455_v24 = vsel %vm439_vm1, %v1285_v22, -inf }
 0x100   : > { %459 = vmax.xlane.f32.xlu0 %v458_v23  ;;  %456 = vmax.xlane.f32.xlu1 %v455_v24 }
 0x104   : > { %462 = vmax.xlane.f32.xlu1 %v461_v25 }
 0x17b   : > { %v448_v28 = vpop.xlane.xlu1 %447 }
 0x17c   : > { %v1306_v30 = vmax.f32 %v1301_v27, %v448_v28 }
 0x17d   : > { %v442_v31 = vpop.xlane.xlu0 %441 }
 0x17e   : > { %v474_v33 = vsub.f32 %v1301_v27, %v1306_v30  ;;  %796 = vst.msk [vmem:[#allocation2 + $0x10] sm:$0xff] %vm262_vm0, %v1306_v30  ;;  %v1315_v34 = vmax.f32 %v1303_v29, %v442_v31  ;;  %508 = vperm.xlu1 %1114, %v1306_v30  }
 0x17f   : > { %v451_v35 = vpop.xlane.xlu1 %450 }
 0x180   : > { %v472_v37 = vsub.f32 %v1303_v29, %v1315_v34  ;;  %794 = vst.msk [vmem:[#allocation2] sm:$0xff] %vm262_vm0, %v1315_v34  ;;  %v1325_v38 = vmax.f32 %v1308_v32, %v451_v35  ;;  %498 = vperm.xlu0 %1113, %v1315_v34  }
 0x181   : > { %v445_v39 = vpop.xlane.xlu0 %444 }
 0x182   : > { %v475_v40 = vsub.f32 %v1308_v32, %v1325_v38  ;;  %797 = vst.msk [vmem:[#allocation2 + $0x18] sm:$0xff] %vm262_vm0, %v1325_v38  ;;  %v1333_v41 = vmax.f32 %v1318_v36, %v445_v39  ;;  %513 = vperm.xlu1 %1114, %v1325_v38  }
 0x184   : > { %v473_v43 = vsub.f32 %v1318_v36, %v1333_v41  ;;  %795 = vst.msk [vmem:[#allocation2 + $0x8] sm:$0xff] %vm262_vm0, %v1333_v41  ;;  %v486_v36 = vmul.f32 1.442695, %v475_v40 }
 0x185   : > { %v454_v44 = vpop.xlane.xlu0 %453 }
 0x186   : > { %v1349_v46 = vmax.f32 %v1336_v42, %v454_v44  ;;  %503 = vperm.xlu1 %1114, %v1333_v41  }
 0x188   : > { %v476_v49 = vsub.f32 %v1336_v42, %v1349_v46  ;;  %798 = vst.msk [vmem:[#allocation2 + $0x20] sm:$0xff] %vm262_vm0, %v1349_v46 }
 0x189   : > { %v460_v50 = vpop.xlane.xlu0 %459  ;;  %v457_v51 = vpop.xlane.xlu1 %456 }
 0x18a   : > { %v1359_v52 = vmax.f32 %v1342_v45, %v460_v50  ;;  %v1362_v53 = vmax.f32 %v1352_v47, %v457_v51  ;;  %v488_v41 = vmul.f32 1.442695, %v476_v49 }
 0x18c   : > { %v478_v56 = vsub.f32 %v1342_v45, %v1359_v52  ;;  %800 = vst.msk [vmem:[#allocation2 + $0x30] sm:$0xff] %vm262_vm0, %v1359_v52  ;;  %v477_v57 = vsub.f32 %v1352_v47, %v1362_v53  ;;  %799 = vst.msk [vmem:[#allocation2 + $0x28] sm:$0xff] %vm262_vm0, %v1362_v53  ;;  %528 = vperm.xlu1 %1114, %v1359_v52   ;;  %v562_v45 = vld [vmem:[#allocation3 + $0x10] sm:$0xff] }
 0x18d   : > { %v463_v58 = vpop.xlane.xlu1 %462 }
 0x18e   : > { %v1376_v59 = vmax.f32 %v1364_v55, %v463_v58  ;;  %v490_v29 = vmul.f32 1.442695, %v477_v57  ;;  %v492_v27 = vmul.f32 1.442695, %v478_v56  ;;  %v563_v56 = vld [vmem:[#allocation3 + $0x18] sm:$0xff] }
 0x190   : > { %v479_v61 = vsub.f32 %v1364_v55, %v1376_v59  ;;  %801 = vst.msk [vmem:[#allocation2 + $0x38] sm:$0xff] %vm262_vm0, %v1376_v59  ;;  %518 = vperm.xlu1 %1114, %v1349_v46   ;;  %v560_v46 = vld [vmem:[#allocation3] sm:$0xff] }
 0x192   : > { %v494_v30 = vmul.f32 1.442695, %v479_v61 }
 0x194   : > { %523 = vperm.xlu1 %1114, %v1362_v53  }
 0x198   : > { %533 = vperm.xlu1 %1114, %v1376_v59   ;;  %v561_v59 = vld [vmem:[#allocation3 + $0x8] sm:$0xff] }
 0x1f9   : > { %v509_v63 = vpop.permute.xlu1 %508 }
 0x1fa   : > { %v538_v0 = vsub.f32 %v1261_v9, %v509_v63 }
 0x1fb   : > { %v499_v1 = vpop.permute.xlu0 %498 }
 0x1fc   : > { %v548_v2 = vmul.f32 1.442695, %v538_v0  ;;  %v536_v3 = vsub.f32 %v1265_v11, %v499_v1  ;;  %v482_v1 = vmul.f32 1.442695, %v473_v43 }
 0x1fd   : > { %v514_v4 = vpop.permute.xlu1 %513 }
 0x1fe   : > { %1127 = vpow2.f32 %v548_v2  ;;  %v544_v5 = vmul.f32 1.442695, %v536_v3  ;;  %v539_v6 = vsub.f32 %v1269_v13, %v514_v4  ;;  %v480_v4 = vmul.f32 1.442695, %v472_v37 }
 0x200   : > { %1129 = vpow2.f32 %v544_v5  ;;  %v550_v7 = vmul.f32 1.442695, %v539_v6  ;;  %v484_v5 = vmul.f32 1.442695, %v474_v33 }
 0x201   : > { %v504_v8 = vpop.permute.xlu1 %503 }
 0x202   : > { %1131 = vpow2.f32 %v550_v7  ;;  %v537_v10 = vsub.f32 %v1273_v15, %v504_v8 }
 0x204   : > { %v546_v12 = vmul.f32 1.442695, %v537_v10 }
 0x206   : > { %1133 = vpow2.f32 %v546_v12 }
 0x207   : > { %v529_v14 = vpop.permute.xlu1 %528 }
 0x208   : > { %v542_v9 = vsub.f32 %v1277_v17, %v529_v14 }
 0x20a   : > { %v556_v13 = vmul.f32 1.442695, %v542_v9 }
 0x20b   : > { %v1128_v16 = vpop.eup %1127  ;;  %v519_v19 = vpop.permute.xlu1 %518 }
 0x20c   : > { %v540_v11 = vsub.f32 %v1279_v18, %v519_v19  ;;  %v582_v21 = vsel %vm439_vm1, %v1128_v16, 0.0 }
 0x20d   : > { %v1130_v23 = vpop.eup %1129  ;;  %583 = vadd.xlane.f32.xlu0 %v582_v21 }
 0x20e   : > { %v552_v24 = vmul.f32 1.442695, %v540_v11  ;;  %v576_v25 = vsel %vm439_vm1, %v1130_v23, 0.0 }
 0x20f   : > { %v1132_v26 = vpop.eup %1131  ;;  %577 = vadd.xlane.f32.xlu1 %v576_v25  ;;  %v524_v15 = vpop.permute.xlu1 %523 }
 0x210   : > { %1135 = vpow2.f32 %v552_v24  ;;  %v541_v28 = vsub.f32 %v1285_v22, %v524_v15  ;;  %v585_v31 = vsel %vm439_vm1, %v1132_v26, 0.0  ;;  %v674_v50 = vpack.c.bf16 %v1132_v26, %v1128_v16  ;;  %v564_v16 = vld [vmem:[#allocation3 + $0x20] sm:$0xff] }
 0x211   : > { %1137 = vpow2.f32 %v556_v13  ;;  %v565_v13 = vld [vmem:[#allocation3 + $0x28] sm:$0xff] }
 0x212   : > { %v554_v17 = vmul.f32 1.442695, %v541_v28 }
 0x213   : > { %v1134_v35 = vpop.eup %1133  ;;  %586 = vadd.xlane.f32.xlu1 %v585_v31  ;;  %v534_v18 = vpop.permute.xlu1 %533  ;;  %v567_v31 = vld [vmem:[#allocation3 + $0x38] sm:$0xff] }
 0x214   : > { %1139 = vpow2.f32 %v554_v17  ;;  %v543_v39 = vsub.f32 %v1283_v20, %v534_v18  ;;  %v579_v44 = vsel %vm439_vm1, %v1134_v35, 0.0  ;;  %v673_v48 = vpack.c.bf16 %v1134_v35, %v1130_v23  ;;  %v566_v23 = vld [vmem:[#allocation3 + $0x30] sm:$0xff] }
 0x215   : > { %580 = vadd.xlane.f32.xlu0 %v579_v44 }
 0x216   : > { %v558_v51 = vmul.f32 1.442695, %v543_v39  ;;  %1078 = vmatprep.mubr.msk.bf16.mxu1 %vm439_vm1, %v673_v48 }
 0x217   : > { %1079 = vmatmul.mubr.msk.bf16.vlgmr.msra.gmra.mxu1 %vm439_vm1, %v674_v50 }
 0x218   : > { %1141 = vpow2.f32 %v558_v51 }
 0x219   : > { %1143 = vpow2.f32 %v482_v1 }
 0x21a   : > { %1145 = vpow2.f32 %v480_v4 }
 0x21b   : > { %1147 = vpow2.f32 %v484_v5 }
 0x21c   : > { %1149 = vpow2.f32 %v486_v36 }
 0x21d   : > { %v1136_v22 = vpop.eup %1135  ;;  %1151 = vpow2.f32 %v488_v41 }
 0x21e   : > { %v588_v54 = vsel %vm439_vm1, %v1136_v22, 0.0  ;;  %v1138_v58 = vpop.eup %1137  ;;  %1153 = vpow2.f32 %v490_v29 }
 0x21f   : > { %589 = vadd.xlane.f32.xlu0 %v588_v54  ;;  %v594_v62 = vsel %vm439_vm1, %v1138_v58, 0.0  ;;  %1155 = vpow2.f32 %v492_v27 }
 0x220   : > { %1157 = vpow2.f32 %v494_v30 }
 0x221   : > { %v1140_v60 = vpop.eup %1139 }
 0x222   : > { %v591_v20 = vsel %vm439_vm1, %v1140_v60, 0.0  ;;  %v675_v63 = vpack.c.bf16 %v1140_v60, %v1136_v22 }
 0x223   : > { %595 = vadd.xlane.f32.xlu0 %v594_v62  ;;  %592 = vadd.xlane.f32.xlu1 %v591_v20 }
 0x224   : > { %1082 = vmatprep.mubr.msk.bf16.mxu1 %vm439_vm1, %v675_v63 }
 0x225   : > { %v1142_v0 = vpop.eup %1141 }
 0x226   : > { %v597_v2 = vsel %vm439_vm1, %v1142_v0, 0.0  ;;  %v676_v3 = vpack.c.bf16 %v1142_v0, %v1138_v58  ;;  %v1144_v32 = vpop.eup %1143 }
 0x227   : > { %598 = vadd.xlane.f32.xlu1 %v597_v2  ;;  %v1146_v33 = vpop.eup %1145  ;;  %v569_v8 = vmul.f32 %v1144_v32, %v561_v59 }
 0x228   : > { %1083 = vmatmul.mubr.msk.bf16.gmra.mxu1 %vm439_vm1, %v676_v3  ;;  %v1148_v34 = vpop.eup %1147  ;;  %v568_v53 = vmul.f32 %v1146_v33, %v560_v46 }
 0x229   : > { %v1150_v37 = vpop.eup %1149  ;;  %v570_v47 = vmul.f32 %v1148_v34, %v562_v45 }
 0x22a   : > { %v1152_v38 = vpop.eup %1151  ;;  %v571_v61 = vmul.f32 %v1150_v37, %v563_v56 }
 0x22b   : > { %v1154_v40 = vpop.eup %1153  ;;  %v572_v11 = vmul.f32 %v1152_v38, %v564_v16 }
 0x22c   : > { %v1156_v42 = vpop.eup %1155  ;;  %v573_v15 = vmul.f32 %v1154_v40, %v565_v13 }
 0x22d   : > { %v1158_v43 = vpop.eup %1157  ;;  %v574_v26 = vmul.f32 %v1156_v42, %v566_v23 }
 0x22e   : > { %v575_v44 = vmul.f32 %v1158_v43, %v567_v31 }
 0x238   : > { %632 = vperm.xlu1 %1114, %v1144_v32  }
 0x239   : > { %627 = vperm.xlu0 %1113, %v1146_v33  }
 0x23c   : > { %637 = vperm.xlu1 %1114, %v1148_v34  }
 0x23d   : > { %642 = vperm.xlu0 %1113, %v1150_v37  }
 0x240   : > { %647 = vperm.xlu1 %1114, %v1152_v38  }
 0x241   : > { %652 = vperm.xlu0 %1113, %v1154_v40  }
 0x244   : > { %657 = vperm.xlu1 %1114, %v1156_v42  }
 0x245   : > { %662 = vperm.xlu0 %1113, %v1158_v43  }
 0x296   : > { %v584_v49 = vpop.xlane.xlu0 %583 }
 0x297   : > { %v602_v52 = vadd.f32 %v584_v49, %v570_v47 }
 0x298   : > { %v578_v55 = vpop.xlane.xlu1 %577 }
 0x299   : > { %611 = vst.msk [vmem:[#allocation3 + $0x10] sm:$0xff] %vm262_vm0, %v602_v52  ;;  %v600_v57 = vadd.f32 %v578_v55, %v568_v53 }
 0x29b   : > { %609 = vst.msk [vmem:[#allocation3] sm:$0xff] %vm262_vm0, %v600_v57 }
 0x29c   : > { %v587_v6 = vpop.xlane.xlu1 %586 }
 0x29d   : > { %v603_v7 = vadd.f32 %v587_v6, %v571_v61 }
 0x29e   : > { %v581_v10 = vpop.xlane.xlu0 %580 }
 0x29f   : > { %612 = vst.msk [vmem:[#allocation3 + $0x18] sm:$0xff] %vm262_vm0, %v603_v7  ;;  %v601_v12 = vadd.f32 %v581_v10, %v569_v8 }
 0x2a0   : > { %v815_v14 = vld [vmem:[#allocation3 + $0x10] sm:$0xff] }
 0x2a1   : > { %610 = vst.msk [vmem:[#allocation3 + $0x8] sm:$0xff] %vm262_vm0, %v601_v12  ;;  %1159 = vrcp.f32 %v815_v14 }
 0x2a2   : > { %v813_v9 = vld [vmem:[#allocation3] sm:$0xff] }
 0x2a3   : > { %1161 = vrcp.f32 %v813_v9 }
 0x2a6   : > { %v816_v19 = vld [vmem:[#allocation3 + $0x18] sm:$0xff] }
 0x2a7   : > { %1163 = vrcp.f32 %v816_v19 }
 0x2a8   : > { %v590_v21 = vpop.xlane.xlu0 %589  ;;  %v814_v24 = vld [vmem:[#allocation3 + $0x8] sm:$0xff] }
 0x2a9   : > { %v604_v25 = vadd.f32 %v590_v21, %v572_v11  ;;  %1165 = vrcp.f32 %v814_v24 }
 0x2ab   : > { %613 = vst.msk [vmem:[#allocation3 + $0x20] sm:$0xff] %vm262_vm0, %v604_v25 }
 0x2ac   : > { %v596_v28 = vpop.xlane.xlu0 %595  ;;  %v593_v17 = vpop.xlane.xlu1 %592 }
 0x2ad   : > { %v606_v35 = vadd.f32 %v596_v28, %v574_v26  ;;  %v605_v18 = vadd.f32 %v593_v17, %v573_v15 }
 0x2ae   : > { %v1160_v39 = vpop.eup %1159 }
 0x2af   : > { %615 = vst.msk [vmem:[#allocation3 + $0x30] sm:$0xff] %vm262_vm0, %v606_v35  ;;  %614 = vst.msk [vmem:[#allocation3 + $0x28] sm:$0xff] %vm262_vm0, %v605_v18  ;;  %841 = vperm.xlu1 %1114, %v1160_v39  }
 0x2b0   : > { %v599_v48 = vpop.xlane.xlu1 %598  ;;  %v1162_v51 = vpop.eup %1161 }
 0x2b1   : > { %v607_v50 = vadd.f32 %v599_v48, %v575_v44 }
 0x2b2   : > { %v817_v22 = vld [vmem:[#allocation3 + $0x20] sm:$0xff] }
 0x2b3   : > { %616 = vst.msk [vmem:[#allocation3 + $0x38] sm:$0xff] %vm262_vm0, %v607_v50  ;;  %831 = vperm.xlu1 %1114, %v1162_v51   ;;  %1167 = vrcp.f32 %v817_v22 }
 0x2b4   : > { %v1164_v54 = vpop.eup %1163  ;;  %v633_v3 = vpop.permute.xlu1 %632 }
 0x2b5   : > { %846 = vperm.xlu0 %1113, %v1164_v54   ;;  %v628_v4 = vpop.permute.xlu0 %627  ;;  %v666_v56 = vmul.f32 0.0, %v633_v3 }
 0x2b6   : > { %v819_v58 = vld [vmem:[#allocation3 + $0x30] sm:$0xff]  ;;  %v818_v60 = vld [vmem:[#allocation3 + $0x28] sm:$0xff]  ;;  %v1166_v62 = vpop.eup %1165  ;;  %v665_v38 = vmul.f32 0.0, %v628_v4 }
 0x2b7   : > { %1169 = vrcp.f32 %v819_v58 }
 0x2b8   : > { %1171 = vrcp.f32 %v818_v60  ;;  %v638_v5 = vpop.permute.xlu1 %637 }
 0x2b9   : > { %836 = vperm.xlu0 %1113, %v1166_v62   ;;  %v643_v36 = vpop.permute.xlu0 %642  ;;  %v667_v32 = vmul.f32 0.0, %v638_v5 }
 0x2ba   : > { %v820_v20 = vld [vmem:[#allocation3 + $0x38] sm:$0xff]  ;;  %v668_v45 = vmul.f32 0.0, %v643_v36 }
 0x2bb   : > { %1173 = vrcp.f32 %v820_v20 }
 0x2bc   : > { %v648_v41 = vpop.permute.xlu1 %647 }
 0x2bd   : > { %v653_v27 = vpop.permute.xlu0 %652  ;;  %v669_v10 = vmul.f32 0.0, %v648_v41 }
 0x2be   : > { %v670_v21 = vmul.f32 0.0, %v653_v27 }
 0x2c0   : > { %v1168_v63 = vpop.eup %1167  ;;  %v658_v30 = vpop.permute.xlu1 %657 }
 0x2c1   : > { %851 = vperm.xlu1 %1114, %v1168_v63   ;;  %v663_v43 = vpop.permute.xlu0 %662  ;;  %v671_v16 = vmul.f32 0.0, %v658_v30 }
 0x2c2   : > { %v672_v15 = vmul.f32 0.0, %v663_v43 }
 0x2c4   : > { %v1170_v0 = vpop.eup %1169 }
 0x2c5   : > { %v1172_v1 = vpop.eup %1171  ;;  %861 = vperm.xlu1 %1114, %v1170_v0  }
 0x2c6   : > { %856 = vperm.xlu0 %1113, %v1172_v1  }
 0x2c8   : > { %v1174_v2 = vpop.eup %1173 }
 0x2ca   : > { %866 = vperm.xlu0 %1113, %v1174_v2  }
 0x2d7   : > { %v1080_v29 = vpop.f32.mrf.mxu1 }
 0x2d8   : > { %v780_v34 = vadd.f32 %v1080_v29, %v667_v32 }
 0x2d9   : > { %v747_v33 = vpop.f32.mrf.mxu1 }
 0x2da   : > { %v778_v46 = vadd.f32 %v747_v33, %v665_v38 }
 0x2db   : > { %v1081_v40 = vpop.f32.mrf.mxu1 }
 0x2dc   : > { %v781_v49 = vadd.f32 %v1081_v40, %v668_v45 }
 0x2dd   : > { %v750_v52 = vpop.f32.mrf.mxu1 }
 0x2de   : > { %v779_v61 = vadd.f32 %v750_v52, %v666_v56 }
 0x2e8   : > { %v1084_v57 = vpop.f32.mrf.mxu1 }
 0x2e9   : > { %v784_v23 = vadd.f32 %v1084_v57, %v671_v16 }
 0x2ea   : > { %v763_v7 = vpop.f32.mrf.mxu1 }
 0x2eb   : > { %v782_v14 = vadd.f32 %v763_v7, %v669_v10 }
 0x2ec   : > { %v1085_v12 = vpop.f32.mrf.mxu1 }
 0x2ed   : > { %v785_v17 = vadd.f32 %v1085_v12, %v672_v15 }
 0x2ee   : > { %v766_v19 = vpop.f32.mrf.mxu1 }
 0x2ef   : > { %v783_v13 = vadd.f32 %v766_v19, %v670_v21 }
 0x32a   : > { %v842_v37 = vpop.permute.xlu1 %841 }
 0x32b   : > { %v871_v42 = vmul.f32 %v842_v37, %v780_v34 }
 0x32d   : > { %879 = vst [vmem:[%s1441_s29 + $0x10] sm:$0xff] %v871_v42 }
 0x32e   : > { %v832_v47 = vpop.permute.xlu1 %831 }
 0x32f   : > { %v869_v53 = vmul.f32 %v832_v47, %v778_v46 }
 0x330   : > { %v847_v55 = vpop.permute.xlu0 %846 }
 0x331   : > { %877 = vst [vmem:[%s1441_s29] sm:$0xff] %v869_v53  ;;  %v872_v59 = vmul.f32 %v847_v55, %v781_v49 }
 0x333   : > { %880 = vst [vmem:[%s1441_s29 + $0x18] sm:$0xff] %v872_v59 }
 0x334   : > { %v837_v6 = vpop.permute.xlu0 %836 }
 0x335   : > { %v870_v8 = vmul.f32 %v837_v6, %v779_v61 }
 0x337   : > { %878 = vst [vmem:[%s1441_s29 + $0x8] sm:$0xff] %v870_v8 }
 0x33c   : > { %v852_v9 = vpop.permute.xlu1 %851 }
 0x33d   : > { %v873_v11 = vmul.f32 %v852_v9, %v782_v14 }
 0x33f   : > { %881 = vst [vmem:[%s1441_s29 + $0x20] sm:$0xff] %v873_v11 }
 0x340   : > { %v862_v24 = vpop.permute.xlu1 %861 }
 0x341   : > { %v857_v25 = vpop.permute.xlu0 %856  ;;  %v875_v26 = vmul.f32 %v862_v24, %v784_v23 }
 0x342   : > { %v874_v28 = vmul.f32 %v857_v25, %v783_v13 }
 0x343   : > { %883 = vst [vmem:[%s1441_s29 + $0x30] sm:$0xff] %v875_v26 }
 0x344   : > { %882 = vst [vmem:[%s1441_s29 + $0x28] sm:$0xff] %v874_v28 }
 0x345   : > { %v867_v31 = vpop.permute.xlu0 %866 }
 0x346   : > { %v876_v35 = vmul.f32 %v867_v31, %v785_v17 }
 0x348   : > { %884 = vst [vmem:[%s1441_s29 + $0x38] sm:$0xff] %v876_v35 }
 0x349 PF: > { %s13_s14 = sadd.s32 1, %s1197_s14   ;;  %s1464_s12 = smov %s1193_s13 }
 0x34a   : > { %p10_p5 = scmp.ge.s32.totalorder %s13_s14, 4   ;;  %s1465_s13 = smov %s1467_s15 }
 0x34c   :  { %12 = sbr.rel (!%p10_p5) target bundleno = 2 (0x2), region = 78 }

</bundles_post_ra>
